<compile_context>
chip_gen: v7x
topology: tpu7x:2x2x1
jax: 0.10.0
libtpu: 0.0.40
codegen_flags: <defaults>
</compile_context>

<pallas_src>
import functools

import jax
import jax.numpy as jnp
from jax.experimental import pallas as pl
from jax.experimental.pallas import tpu as pltpu


def _round_up(x, m):
    return ((x + m - 1) // m) * m


def _pair_ax_kernel(action_dim, max_action,
                    state_ref, action_ref, w_a_ref, w_s_ref, w1_ref, w2_ref, bias_ref,
                    out_ref):
    f32 = jnp.float32
    wdt = w1_ref.dtype

    # All biases live in one (3, 256) f32 slab; static slices are free.
    b_a = bias_ref[0:1, 0:128]
    b_s = bias_ref[0:1, 128:256]
    b_1 = bias_ref[1:2, 0:256]
    b_2 = bias_ref[2:3, 0:action_dim]

    # Layer 1: the two branch Linears (+ReLU). Each K <= 128 -> one MXU pass each.
    a = jnp.dot(action_ref[...].astype(wdt), w_a_ref[...], preferred_element_type=f32) + b_a
    a = jnp.maximum(a, 0.0)
    s = jnp.dot(state_ref[...].astype(wdt), w_s_ref[...], preferred_element_type=f32) + b_s
    s = jnp.maximum(s, 0.0)

    # Layer 2: concat([a, s]) is a lane-aligned (128|128) placement -> single K=256 matmul
    # (halves MXU pushes for the dominant 256x256 layer on v6e/v7x vs two K=128 dots).
    x = jnp.concatenate([a.astype(wdt), s.astype(wdt)], axis=1)        # (tb, 256)
    h = jnp.dot(x, w1_ref[...], preferred_element_type=f32) + b_1
    h = jnp.maximum(h, 0.0)

    # Layer 3: un-padded head (only action_dim lanes are written back), Tanh, scale.
    o = jnp.dot(h.astype(wdt), w2_ref[...], preferred_element_type=f32) + b_2
    out_ref[...] = (jnp.tanh(o) * max_action).astype(out_ref.dtype)


def pack_params(params, dtype=jnp.float32):
    """Pack torch-layout params (W: (out,in), b: (out,)) into the kernel's fused arrays."""
    action_dim = params["w2"].shape[0]
    state_dim = params["ws"].shape[1]
    assert params["wa"].shape == (128, action_dim)
    assert params["ws"].shape == (128, state_dim)
    assert params["w1"].shape == (256, 256)
    assert params["w2"].shape == (action_dim, 256)
    assert action_dim <= 256, "bias slab assumes action_dim <= 256"

    w_a = params["wa"].T.astype(dtype)       # (A, 128)
    w_s = params["ws"].T.astype(dtype)       # (S, 128)
    w1 = params["w1"].T.astype(dtype)        # (256, 256)
    w2 = params["w2"].T.astype(dtype)        # (256, A)   un-padded head

    def _row(v):
        return jnp.pad(v, (0, 256 - v.shape[0]))[None, :]

    bias = jnp.concatenate([
        _row(jnp.concatenate([params["ba"], params["bs"]])),   # [b_action | b_state]
        _row(params["b1"]),
        _row(params["b2"]),
    ], axis=0).astype(jnp.float32)                              # (3, 256)

    return {"w_a": w_a, "w_s": w_s, "w1": w1, "w2": w2, "bias": bias,
            "action_dim": action_dim, "state_dim": state_dim}


def pair_ax_forward(packed, state, action, *, max_action=1.0,
                    batch_tile=1024, split_threshold=256):
    """Forward pass of PairAxmodel on packed params. Returns (batch, action_dim) f32."""
    assert state.ndim == 2 and action.ndim == 2 and state.shape[0] == action.shape[0]
    batch = state.shape[0]
    state_dim = packed["state_dim"]
    action_dim = packed["action_dim"]
    assert state.shape[1] == state_dim and action.shape[1] == action_dim

    # No wrapper casts / pads / slices: native-dtype inputs go straight to the kernel and
    # the ragged tail (batch % tb != 0) is handled by Pallas edge masking on the grid.
    if batch <= split_threshold:
        tb = batch                                   # single step; block == full extent (legal)
    else:
        # >= 2 balanced grid steps so ("parallel",) shards across v7x's two TensorCores,
        # capped at batch_tile to amortize step overhead while staying inside scoped VMEM.
        tb = min(batch_tile, _round_up(pl.cdiv(batch, 2), 8))
    grid = (pl.cdiv(batch, tb),)

    resident = lambda i: (0, 0)          # weights/bias: same block every step -> VMEM-resident
    kernel = functools.partial(_pair_ax_kernel, action_dim, float(max_action))

    return pl.pallas_call(
        kernel,
        out_shape=jax.ShapeDtypeStruct((batch, action_dim), jnp.float32),
        grid=grid,
        in_specs=[
            pl.BlockSpec((tb, state_dim), lambda i: (i, 0)),
            pl.BlockSpec((tb, action_dim), lambda i: (i, 0)),
            pl.BlockSpec(packed["w_a"].shape, resident),
            pl.BlockSpec(packed["w_s"].shape, resident),
            pl.BlockSpec(packed["w1"].shape, resident),
            pl.BlockSpec(packed["w2"].shape, resident),
            pl.BlockSpec(packed["bias"].shape, resident),
        ],
        out_specs=pl.BlockSpec((tb, action_dim), lambda i: (i, 0)),
        compiler_params=pltpu.CompilerParams(dimension_semantics=("parallel",)),
    )(state, action, packed["w_a"], packed["w_s"], packed["w1"], packed["w2"], packed["bias"])


def init_params(key, state_dim, action_dim):
    """PyTorch-default-style init (uniform +-1/sqrt(fan_in)), torch layout W:(out,in), b:(out,)."""
    def linear(k, fan_in, fan_out):
        k1, k2 = jax.random.split(k)
        lim = 1.0 / (fan_in ** 0.5)
        w = jax.random.uniform(k1, (fan_out, fan_in), jnp.float32, -lim, lim)
        b = jax.random.uniform(k2, (fan_out,), jnp.float32, -lim, lim)
        return w, b

    ka, ks, k1, k2 = jax.random.split(key, 4)
    wa, ba = linear(ka, action_dim, 128)   # action_fc
    ws, bs = linear(ks, state_dim, 128)    # state_fc
    w1, b1 = linear(k1, 256, 256)          # fc[0]
    w2, b2 = linear(k2, 256, action_dim)   # fc[2]
    return {"wa": wa, "ba": ba, "ws": ws, "bs": bs,
            "w1": w1, "b1": b1, "w2": w2, "b2": b2}


def _reference(params, state, action, max_action=1.0):
    """Plain-JAX replica of PairAxmodel.forward."""
    a = jnp.maximum(action @ params["wa"].T + params["ba"], 0.0)
    s = jnp.maximum(state @ params["ws"].T + params["bs"], 0.0)
    x = jnp.concatenate([a, s], axis=1)
    h = jnp.maximum(x @ params["w1"].T + params["b1"], 0.0)
    return jnp.tanh(h @ params["w2"].T + params["b2"]) * max_action


if __name__ == "__main__":
    key = jax.random.PRNGKey(0)
    batch, state_dim, action_dim = 8, 16, 8

    key, kp, ks, ka = jax.random.split(key, 4)
    params = init_params(kp, state_dim, action_dim)
    packed = pack_params(params)                       # done once; reused for every forward

    state = jax.random.normal(ks, (batch, state_dim), jnp.float32)
    action = jax.random.normal(ka, (batch, action_dim), jnp.float32)

    out = pair_ax_forward(packed, state, action)
    jax.block_until_ready(out)
    ref = _reference(params, state, action)
    assert out.shape == (batch, action_dim)
    assert jnp.allclose(out, ref, atol=2e-3, rtol=2e-3), "mismatch vs reference (small batch)"

    # Larger ragged batch: exercises the >=2-step parallel grid, VMEM-resident weights and
    # Pallas edge masking (no wrapper pad / slice).
    key, ks2, ka2 = jax.random.split(key, 3)
    big = 300
    state2 = jax.random.normal(ks2, (big, state_dim), jnp.float32)
    action2 = jax.random.normal(ka2, (big, action_dim), jnp.float32)
    out2 = pair_ax_forward(packed, state2, action2)
    jax.block_until_ready(out2)
    ref2 = _reference(params, state2, action2)
    assert out2.shape == (big, action_dim)
    assert jnp.allclose(out2, ref2, atol=2e-3, rtol=2e-3), "mismatch vs reference (ragged grid)"

    print("KERNEL_OK")
</pallas_src>

<mosaic_0001>
module attributes {stable_mosaic.version = 11 : i64} {
  func.func @_pair_ax_kernel(%arg0: i32, %arg1: memref<8x16xf32, #tpu.memory_space<vmem>>, %arg2: memref<8x8xf32, #tpu.memory_space<vmem>>, %arg3: memref<8x128xf32, #tpu.memory_space<vmem>>, %arg4: memref<16x128xf32, #tpu.memory_space<vmem>>, %arg5: memref<256x256xf32, #tpu.memory_space<vmem>>, %arg6: memref<256x8xf32, #tpu.memory_space<vmem>>, %arg7: memref<3x256xf32, #tpu.memory_space<vmem>>, %arg8: memref<8x8xf32, #tpu.memory_space<vmem>>) attributes {dimension_semantics = [#tpu.dimension_semantics<parallel>], iteration_bounds = array<i64: 1>, scalar_prefetch = 0 : i64, scratch_operands = 0 : i64, tpu.core_type = #tpu.core_type<tc>, window_params = [{transform_indices = @transform_0, window_bounds = array<i64: 8, 16>}, {transform_indices = @transform_1, window_bounds = array<i64: 8, 8>}, {pipeline_mode = #tpu.pipeline_mode<synchronous>, transform_indices = @transform_2, window_bounds = array<i64: 8, 128>}, {pipeline_mode = #tpu.pipeline_mode<synchronous>, transform_indices = @transform_3, window_bounds = array<i64: 16, 128>}, {pipeline_mode = #tpu.pipeline_mode<synchronous>, transform_indices = @transform_4, window_bounds = array<i64: 256, 256>}, {pipeline_mode = #tpu.pipeline_mode<synchronous>, transform_indices = @transform_5, window_bounds = array<i64: 256, 8>}, {pipeline_mode = #tpu.pipeline_mode<synchronous>, transform_indices = @transform_6, window_bounds = array<i64: 3, 256>}, {transform_indices = @transform_7, window_bounds = array<i64: 8, 8>}]} {
    %c0 = arith.constant 0 : index
    %c0_0 = arith.constant 0 : index
    %0 = vector.load %arg7[%c0, %c0_0] : memref<3x256xf32, #tpu.memory_space<vmem>>, vector<1x128xf32>
    %c0_1 = arith.constant 0 : index
    %c128 = arith.constant 128 : index
    %1 = vector.load %arg7[%c0_1, %c128] : memref<3x256xf32, #tpu.memory_space<vmem>>, vector<1x128xf32>
    %c1 = arith.constant 1 : index
    %c0_2 = arith.constant 0 : index
    %2 = vector.load %arg7[%c1, %c0_2] : memref<3x256xf32, #tpu.memory_space<vmem>>, vector<1x256xf32>
    %c2 = arith.constant 2 : index
    %c0_3 = arith.constant 0 : index
    %3 = vector.load %arg7[%c2, %c0_3] : memref<3x256xf32, #tpu.memory_space<vmem>>, vector<1x8xf32>
    %c0_4 = arith.constant 0 : index
    %c0_5 = arith.constant 0 : index
    %4 = vector.load %arg2[%c0_4, %c0_5] : memref<8x8xf32, #tpu.memory_space<vmem>>, vector<8x8xf32>
    %c0_6 = arith.constant 0 : index
    %c0_7 = arith.constant 0 : index
    %5 = vector.load %arg3[%c0_6, %c0_7] : memref<8x128xf32, #tpu.memory_space<vmem>>, vector<8x128xf32>
    %cst = arith.constant dense<0.000000e+00> : vector<8x128xf32>
    %6 = tpu.matmul %4, %5, %cst {dimension_numbers = #tpu.dot_dimension_numbers<[1], [0], [0], [1], [0, 0, 1, 1], [], []>} : vector<8x8xf32>, vector<8x128xf32>, vector<8x128xf32> -> vector<8x128xf32>
    %7 = vector.broadcast %0 : vector<1x128xf32> to vector<8x128xf32>
    %8 = arith.addf %6, %7 : vector<8x128xf32>
    %cst_8 = arith.constant 0.000000e+00 : f32
    %9 = vector.broadcast %cst_8 : f32 to vector<8x128xf32>
    %10 = arith.maximumf %8, %9 : vector<8x128xf32>
    %c0_9 = arith.constant 0 : index
    %c0_10 = arith.constant 0 : index
    %11 = vector.load %arg1[%c0_9, %c0_10] : memref<8x16xf32, #tpu.memory_space<vmem>>, vector<8x16xf32>
    %c0_11 = arith.constant 0 : index
    %c0_12 = arith.constant 0 : index
    %12 = vector.load %arg4[%c0_11, %c0_12] : memref<16x128xf32, #tpu.memory_space<vmem>>, vector<16x128xf32>
    %cst_13 = arith.constant dense<0.000000e+00> : vector<8x128xf32>
    %13 = tpu.matmul %11, %12, %cst_13 {dimension_numbers = #tpu.dot_dimension_numbers<[1], [0], [0], [1], [0, 0, 1, 1], [], []>} : vector<8x16xf32>, vector<16x128xf32>, vector<8x128xf32> -> vector<8x128xf32>
    %14 = vector.broadcast %1 : vector<1x128xf32> to vector<8x128xf32>
    %15 = arith.addf %13, %14 : vector<8x128xf32>
    %cst_14 = arith.constant 0.000000e+00 : f32
    %16 = vector.broadcast %cst_14 : f32 to vector<8x128xf32>
    %17 = arith.maximumf %15, %16 : vector<8x128xf32>
    %18 = tpu.concatenate %10, %17 in 1 : vector<8x128xf32>, vector<8x128xf32> -> vector<8x256xf32>
    %c0_15 = arith.constant 0 : index
    %c0_16 = arith.constant 0 : index
    %19 = vector.load %arg5[%c0_15, %c0_16] : memref<256x256xf32, #tpu.memory_space<vmem>>, vector<256x256xf32>
    %cst_17 = arith.constant dense<0.000000e+00> : vector<8x256xf32>
    %20 = tpu.matmul %18, %19, %cst_17 {dimension_numbers = #tpu.dot_dimension_numbers<[1], [0], [0], [1], [0, 0, 1, 1], [], []>} : vector<8x256xf32>, vector<256x256xf32>, vector<8x256xf32> -> vector<8x256xf32>
    %21 = vector.broadcast %2 : vector<1x256xf32> to vector<8x256xf32>
    %22 = arith.addf %20, %21 : vector<8x256xf32>
    %cst_18 = arith.constant 0.000000e+00 : f32
    %23 = vector.broadcast %cst_18 : f32 to vector<8x256xf32>
    %24 = arith.maximumf %22, %23 : vector<8x256xf32>
    %c0_19 = arith.constant 0 : index
    %c0_20 = arith.constant 0 : index
    %25 = vector.load %arg6[%c0_19, %c0_20] : memref<256x8xf32, #tpu.memory_space<vmem>>, vector<256x8xf32>
    %cst_21 = arith.constant dense<0.000000e+00> : vector<8x8xf32>
    %26 = tpu.matmul %24, %25, %cst_21 {dimension_numbers = #tpu.dot_dimension_numbers<[1], [0], [0], [1], [0, 0, 1, 1], [], []>} : vector<8x256xf32>, vector<256x8xf32>, vector<8x8xf32> -> vector<8x8xf32>
    %27 = vector.broadcast %3 : vector<1x8xf32> to vector<8x8xf32>
    %28 = arith.addf %26, %27 : vector<8x8xf32>
    %29 = math.tanh %28 : vector<8x8xf32>
    %cst_22 = arith.constant 1.000000e+00 : f32
    %30 = vector.broadcast %cst_22 : f32 to vector<8x8xf32>
    %31 = arith.mulf %29, %30 : vector<8x8xf32>
    %c0_23 = arith.constant 0 : index
    %c0_24 = arith.constant 0 : index
    %32 = vector.load %arg8[%c0_23, %c0_24] : memref<8x8xf32, #tpu.memory_space<vmem>>, vector<8x8xf32>
    tpu.vector_store %arg8[%c0_23, %c0_24], %31 {strides = array<i32>} : memref<8x8xf32, #tpu.memory_space<vmem>>, vector<8x8xf32>,
    return
  }
  func.func @transform_0(%arg0: i32) -> (i32, i32) {
    %c0_i32 = arith.constant 0 : i32
    %c0_i32_0 = arith.constant 0 : i32
    return %arg0, %c0_i32 : i32, i32
  }
  func.func @transform_1(%arg0: i32) -> (i32, i32) {
    %c0_i32 = arith.constant 0 : i32
    %c0_i32_0 = arith.constant 0 : i32
    return %arg0, %c0_i32 : i32, i32
  }
  func.func @transform_2(%arg0: i32) -> (i32, i32) {
    %c0_i32 = arith.constant 0 : i32
    %c0_i32_0 = arith.constant 0 : i32
    %c0_i32_1 = arith.constant 0 : i32
    return %c0_i32, %c0_i32_0 : i32, i32
  }
  func.func @transform_3(%arg0: i32) -> (i32, i32) {
    %c0_i32 = arith.constant 0 : i32
    %c0_i32_0 = arith.constant 0 : i32
    %c0_i32_1 = arith.constant 0 : i32
    return %c0_i32, %c0_i32_0 : i32, i32
  }
  func.func @transform_4(%arg0: i32) -> (i32, i32) {
    %c0_i32 = arith.constant 0 : i32
    %c0_i32_0 = arith.constant 0 : i32
    %c0_i32_1 = arith.constant 0 : i32
    return %c0_i32, %c0_i32_0 : i32, i32
  }
  func.func @transform_5(%arg0: i32) -> (i32, i32) {
    %c0_i32 = arith.constant 0 : i32
    %c0_i32_0 = arith.constant 0 : i32
    %c0_i32_1 = arith.constant 0 : i32
    return %c0_i32, %c0_i32_0 : i32, i32
  }
  func.func @transform_6(%arg0: i32) -> (i32, i32) {
    %c0_i32 = arith.constant 0 : i32
    %c0_i32_0 = arith.constant 0 : i32
    %c0_i32_1 = arith.constant 0 : i32
    return %c0_i32, %c0_i32_0 : i32, i32
  }
  func.func @transform_7(%arg0: i32) -> (i32, i32) {
    %c0_i32 = arith.constant 0 : i32
    %c0_i32_0 = arith.constant 0 : i32
    return %arg0, %c0_i32 : i32, i32
  }
}

</mosaic_0001>

<bundles_post_ra>
// kernel: tpu_custom_call.1
= control target key start
LH: loop header
LB: loop body
LE: loop exit
PB: predicated region body
PF: predicated region fallthrough
CT: control target
= control target key end

     0   :  { %12 = vsyncpa [#allocation3], 0  ;;  %s892_s0 = inlined_call_operand.vmem [shape: f32[8,16], index: 0, kind: input, shape index: {}]   ;;  %s893_s1 = inlined_call_operand.vmem [shape: f32[8,8], index: 1, kind: input, shape index: {}]   ;;  %s894_s2 = inlined_call_operand.vmem [shape: f32[8,128], index: 2, kind: input, shape index: {}]   ;;  %s895_s3 = inlined_call_operand.vmem [shape: f32[16,128], index: 3, kind: input, shape index: {}]   ;;  %s896_s4 = inlined_call_operand.hbm [shape: f32[256,256], index: 4, kind: input, shape index: {}]   ;;  %s897_s5 = inlined_call_operand.vmem [shape: f32[256,8], index: 5, kind: input, shape index: {}]   ;;  %s898_s6 = inlined_call_operand.vmem [shape: f32[3,256], index: 6, kind: input, shape index: {}]   ;;  %s899_s7 = inlined_call_operand.hbm [shape: f32[8,8], index: 7, kind: output, shape index: {}]  }
   0x1   :  { %13 = vsyncpa [#allocation4], 0  ;;  %s694_s24 = smov [#allocation2]   ;;  %s646_s28 = scalar_lea.hbm %s896_s4, 8192 }
   0x2   :  { %s27_s25 = sshll.u32 %s694_s24, 4  ;;  %p647_p0 = scmp.ne.s32.totalorder %s896_s4, %s646_s28  ;;  %s28_s25 = int_to_ptr.vmem [resolvable:$true] %s27_s25 }
   0x3   :  { %p650_p1 = scmp.lt.u32.totalorder %s646_s28, %s896_s4 }
   0x5   :  { %p652_p2 = pnand %p650_p1, %p647_p0 }
   0x7   :  { %655 = shalt.err (!%p652_p2)
}
   0x8   :  { %s656_s10 = scalar_lea.vmem %s28_s25, 8192  ;;  %p661_p4 = scmp.lt.s32.totalorder %s28_s25, %s28_s25 }
   0x9   :  { %p657_p3 = scmp.ne.s32.totalorder %s28_s25, %s656_s10  ;;  %p662_p5 = scmp.lt.s32.totalorder %s656_s10, %s656_s10 }
   0xb   :  { %p663_p6 = por %p662_p5, %p661_p4 }
   0xd   :  { %p664_p7 = pnand %p663_p6, %p657_p3 }
   0xf   :  { %667 = shalt.err (!%p664_p7)
}
  0x10   :  { %s695_s11 = smov 256   ;;  %s696_s12 = smov 16  }
  0x11   :  { %33 = dma.hbm_to_vmem [thread:$0]  %s896_s4, 8192, %s28_s25, [#allocation3], %s695_s11, %s695_s11, %s696_s12  }
  0x12   :  { %690 = dma.done.wait [#allocation3], 8192  }
  0x13   :  { %691 = vsyncadd [#allocation3], 4294959104  ;;  %v697_v0 = vmov 0.0   ;;  %vm698_vm0 = vmmov 0   ;;  %vm52_vm1 = vcmask 64512   ;;  %v47_v1 = vld [vmem:[%s894_s2] sm:$0xff] }
  0x14   :  { %526 = vmatprep.subr.mxu1 %v697_v0  ;;  %528 = vmatprep.mubr.msk.f32.mxu1 %vm698_vm0, %v697_v0  ;;  %v46_v2 = vld [vmem:[%s893_s1] sm:$0xff]  ;;  %v129_v4 = vld [vmem:[%s895_s3 + $0x8] sm:$0xff]  ;;  %v699_v6 = vmov 0.0|0.0   ;;  %v212_v9 = vld [vmem:[#allocation2 + $0x18] sm:$0xff]  ;;  %vm134_vm2 = vcmask 130048   ;;  %s700_s12 = smov [#allocation5]  }
  0x15   :  { %v128_v3 = vld [vmem:[%s895_s3] sm:$0xff]  ;;  %527 = vmatpush3.msra.mxu1 %v47_v1  ;;  %v210_v5 = vld [vmem:[#allocation2 + $0x8] sm:$0xff]  ;;  %v211_v11 = vld [vmem:[#allocation2 + $0x10] sm:$0xff]  ;;  %s471_s13 = sshll.u32 %s700_s12, 4  ;;  %s472_s13 = int_to_ptr.vmem [resolvable:$true] %s471_s13 }
  0x16   :  { %529 = vmatmul.mubr.msk.f32.vlgmr.msra.gmra.mrb[0].mxu1 %vm52_vm1, %v46_v2  ;;  %538 = vmatprep.subr.bf16.mxu1 %v699_v6  ;;  %v539_v7 = vpack.c.bf16 %v129_v4, %v128_v3  ;;  %v127_v8 = vld [vmem:[%s892_s0] sm:$0xff]  ;;  %v541_v12 = vpack.c.bf16 %v212_v9, %v210_v5  ;;  %v214_v14 = vld [vmem:[#allocation2 + $0x28] sm:$0xff]  ;;  %v216_v15 = vld [vmem:[#allocation2 + $0x38] sm:$0xff]  ;;  %s668_s14 = scalar_lea.vmem %s472_s13, 128  ;;  %p673_p9 = scmp.lt.s32.totalorder %s472_s13, %s472_s13 }
  0x17   :  { %v209_v10 = vld [vmem:[#allocation2] sm:$0xff]  ;;  %535 = vmatprep.mubr.msk.f32.mxu1 %vm698_vm0, %v697_v0  ;;  %v545_v17 = vpack.c.bf16 %v216_v15, %v214_v14  ;;  %v215_v18 = vld [vmem:[#allocation2 + $0x30] sm:$0xff]  ;;  %v218_v19 = vld [vmem:[#allocation2 + $0x48] sm:$0xff]  ;;  %p669_p8 = scmp.ne.s32.totalorder %s472_s13, %s668_s14  ;;  %p674_p10 = scmp.lt.s32.totalorder %s668_s14, %s668_s14 }
  0x18   :  { %v543_v13 = vpack.c.bf16 %v211_v11, %v209_v10  ;;  %v213_v16 = vld [vmem:[#allocation2 + $0x20] sm:$0xff]  ;;  %540 = vmatpush3.bf16.msra.mxu1 %v539_v7  ;;  %v220_v20 = vld [vmem:[#allocation2 + $0x58] sm:$0xff]  ;;  %542 = vmatprep.subr.bf16.mxu0 %v541_v12  ;;  %v219_v24 = vld [vmem:[#allocation2 + $0x50] sm:$0xff] }
  0x19   :  { %v547_v21 = vpack.c.bf16 %v215_v18, %v213_v16  ;;  %v549_v22 = vpack.c.bf16 %v220_v20, %v218_v19  ;;  %v217_v23 = vld [vmem:[#allocation2 + $0x40] sm:$0xff]  ;;  %v222_v25 = vld [vmem:[#allocation2 + $0x68] sm:$0xff]  ;;  %v224_v26 = vld [vmem:[#allocation2 + $0x78] sm:$0xff]  ;;  %p675_p11 = por %p674_p10, %p673_p9 }
  0x1a   :  { %544 = vmatpush1.bf16.msra.mxu0 %v543_v13  ;;  %v551_v27 = vpack.c.bf16 %v219_v24, %v217_v23  ;;  %v553_v28 = vpack.c.bf16 %v224_v26, %v222_v25  ;;  %v221_v29 = vld [vmem:[#allocation2 + $0x60] sm:$0xff]  ;;  %v223_v30 = vld [vmem:[#allocation2 + $0x70] sm:$0xff]  ;;  %v226_v31 = vld [vmem:[#allocation2 + $0x88] sm:$0xff] }
  0x1b   :  { %536 = vmatmul.mubr.msk.f32.vlgmr.msra.gmra.mrb[2].mxu1 %vm134_vm2, %v127_v8  ;;  %546 = vmatprep.subr.bf16.mxu0 %v545_v17  ;;  %v228_v32 = vld [vmem:[#allocation2 + $0x98] sm:$0xff]  ;;  %v555_v33 = vpack.c.bf16 %v223_v30, %v221_v29  ;;  %v225_v35 = vld [vmem:[#allocation2 + $0x80] sm:$0xff]  ;;  %v227_v36 = vld [vmem:[#allocation2 + $0x90] sm:$0xff]  ;;  %p676_p12 = pnand %p675_p11, %p669_p8 }
  0x1c   :  { %v557_v34 = vpack.c.bf16 %v228_v32, %v226_v31  ;;  %v230_v37 = vld [vmem:[#allocation2 + $0xa8] sm:$0xff]  ;;  %v232_v38 = vld [vmem:[#allocation2 + $0xb8] sm:$0xff]  ;;  %v559_v39 = vpack.c.bf16 %v227_v36, %v225_v35  ;;  %v229_v41 = vld [vmem:[#allocation2 + $0xa0] sm:$0xff] }
  0x1d   :  { %v561_v40 = vpack.c.bf16 %v232_v38, %v230_v37  ;;  %v231_v42 = vld [vmem:[#allocation2 + $0xb0] sm:$0xff]  ;;  %v234_v43 = vld [vmem:[#allocation2 + $0xc8] sm:$0xff]  ;;  %v236_v44 = vld [vmem:[#allocation2 + $0xd8] sm:$0xff] }
  0x1e   :  { %548 = vmatpush1.bf16.msra.mxu0 %v547_v21  ;;  %v563_v45 = vpack.c.bf16 %v231_v42, %v229_v41  ;;  %v565_v46 = vpack.c.bf16 %v236_v44, %v234_v43  ;;  %v233_v47 = vld [vmem:[#allocation2 + $0xc0] sm:$0xff]  ;;  %v235_v48 = vld [vmem:[#allocation2 + $0xd0] sm:$0xff]  ;;  %v238_v49 = vld [vmem:[#allocation2 + $0xe8] sm:$0xff] }
  0x1f   :  { %550 = vmatprep.subr.bf16.mxu0 %v549_v22  ;;  %v240_v50 = vld [vmem:[#allocation2 + $0xf8] sm:$0xff]  ;;  %v567_v51 = vpack.c.bf16 %v235_v48, %v233_v47  ;;  %v237_v53 = vld [vmem:[#allocation2 + $0xe0] sm:$0xff]  ;;  %v239_v54 = vld [vmem:[#allocation2 + $0xf0] sm:$0xff] }
  0x20   :  { %v569_v52 = vpack.c.bf16 %v240_v50, %v238_v49  ;;  %v242_v55 = vld [vmem:[#allocation2 + $0x108] sm:$0xff]  ;;  %v244_v56 = vld [vmem:[#allocation2 + $0x118] sm:$0xff]  ;;  %v571_v57 = vpack.c.bf16 %v239_v54, %v237_v53  ;;  %v241_v59 = vld [vmem:[#allocation2 + $0x100] sm:$0xff] }
  0x21   :  { %v573_v58 = vpack.c.bf16 %v244_v56, %v242_v55  ;;  %v243_v60 = vld [vmem:[#allocation2 + $0x110] sm:$0xff]  ;;  %v246_v61 = vld [vmem:[#allocation2 + $0x128] sm:$0xff]  ;;  %v248_v62 = vld [vmem:[#allocation2 + $0x138] sm:$0xff] }
  0x22   :  { %552 = vmatpush1.bf16.msra.mxu0 %v551_v27  ;;  %v575_v63 = vpack.c.bf16 %v243_v60, %v241_v59  ;;  %v577_v0 = vpack.c.bf16 %v248_v62, %v246_v61  ;;  %v245_v1 = vld [vmem:[#allocation2 + $0x120] sm:$0xff]  ;;  %v247_v2 = vld [vmem:[#allocation2 + $0x130] sm:$0xff]  ;;  %v250_v3 = vld [vmem:[#allocation2 + $0x148] sm:$0xff] }
  0x23   :  { %554 = vmatprep.subr.bf16.mxu0 %v553_v28  ;;  %v252_v4 = vld [vmem:[#allocation2 + $0x158] sm:$0xff]  ;;  %v579_v5 = vpack.c.bf16 %v247_v2, %v245_v1  ;;  %v249_v7 = vld [vmem:[#allocation2 + $0x140] sm:$0xff]  ;;  %v251_v8 = vld [vmem:[#allocation2 + $0x150] sm:$0xff] }
  0x24   :  { %v581_v6 = vpack.c.bf16 %v252_v4, %v250_v3  ;;  %v254_v9 = vld [vmem:[#allocation2 + $0x168] sm:$0xff]  ;;  %v256_v10 = vld [vmem:[#allocation2 + $0x178] sm:$0xff]  ;;  %v583_v11 = vpack.c.bf16 %v251_v8, %v249_v7  ;;  %v253_v13 = vld [vmem:[#allocation2 + $0x160] sm:$0xff] }
  0x25   :  { %v585_v12 = vpack.c.bf16 %v256_v10, %v254_v9  ;;  %v255_v14 = vld [vmem:[#allocation2 + $0x170] sm:$0xff]  ;;  %v258_v15 = vld [vmem:[#allocation2 + $0x188] sm:$0xff]  ;;  %v260_v16 = vld [vmem:[#allocation2 + $0x198] sm:$0xff] }
  0x26   :  { %556 = vmatpush1.bf16.msra.mxu0 %v555_v33  ;;  %v587_v17 = vpack.c.bf16 %v255_v14, %v253_v13  ;;  %v589_v18 = vpack.c.bf16 %v260_v16, %v258_v15  ;;  %v257_v19 = vld [vmem:[#allocation2 + $0x180] sm:$0xff]  ;;  %v259_v20 = vld [vmem:[#allocation2 + $0x190] sm:$0xff]  ;;  %v262_v21 = vld [vmem:[#allocation2 + $0x1a8] sm:$0xff] }
  0x27   :  { %558 = vmatprep.subr.bf16.mxu0 %v557_v34  ;;  %v264_v22 = vld [vmem:[#allocation2 + $0x1b8] sm:$0xff]  ;;  %v591_v23 = vpack.c.bf16 %v259_v20, %v257_v19  ;;  %v261_v25 = vld [vmem:[#allocation2 + $0x1a0] sm:$0xff]  ;;  %v263_v26 = vld [vmem:[#allocation2 + $0x1b0] sm:$0xff] }
  0x28   :  { %v593_v24 = vpack.c.bf16 %v264_v22, %v262_v21  ;;  %v595_v27 = vpack.c.bf16 %v263_v26, %v261_v25  ;;  %v266_v28 = vld [vmem:[#allocation2 + $0x1c8] sm:$0xff]  ;;  %v268_v29 = vld [vmem:[#allocation2 + $0x1d8] sm:$0xff]  ;;  %v265_v31 = vld [vmem:[#allocation2 + $0x1c0] sm:$0xff] }
  0x29   :  { %v597_v30 = vpack.c.bf16 %v268_v29, %v266_v28  ;;  %v267_v32 = vld [vmem:[#allocation2 + $0x1d0] sm:$0xff]  ;;  %v270_v34 = vld [vmem:[#allocation2 + $0x1e8] sm:$0xff]  ;;  %v272_v35 = vld [vmem:[#allocation2 + $0x1f8] sm:$0xff] }
  0x2a   :  { %560 = vmatpush1.bf16.msra.mxu0 %v559_v39  ;;  %v599_v33 = vpack.c.bf16 %v267_v32, %v265_v31  ;;  %v601_v36 = vpack.c.bf16 %v272_v35, %v270_v34  ;;  %v269_v37 = vld [vmem:[#allocation2 + $0x1e0] sm:$0xff]  ;;  %v271_v38 = vld [vmem:[#allocation2 + $0x1f0] sm:$0xff]  ;;  %v374_v41 = vld [vmem:[%s897_s5 + $0x88] sm:$0xff]  ;;  %v274_v34 = vlaneseq }
  0x2b   :  { %562 = vmatprep.subr.bf16.mxu0 %v561_v40  ;;  %v603_v39 = vpack.c.bf16 %v271_v38, %v269_v37  ;;  %v373_v40 = vld [vmem:[%s897_s5 + $0x80] sm:$0xff]  ;;  %v358_v44 = vld [vmem:[%s897_s5 + $0x8] sm:$0xff]  ;;  %v359_v49 = vld [vmem:[%s897_s5 + $0x10] sm:$0xff] }
  0x2c   :  { %v357_v42 = vld [vmem:[%s897_s5] sm:$0xff]  ;;  %v605_v43 = vpack.c.bf16 %v374_v41, %v373_v40  ;;  %v360_v50 = vld [vmem:[%s897_s5 + $0x18] sm:$0xff]  ;;  %v362_v56 = vld [vmem:[%s897_s5 + $0x28] sm:$0xff]  ;;  %v275_v35 = vshrl.u32 %v274_v34, 7 }
  0x2d   :  { %v607_v47 = vpack.c.bf16 %v358_v44, %v357_v42  ;;  %v611_v53 = vpack.c.bf16 %v360_v50, %v359_v49  ;;  %v361_v55 = vld [vmem:[%s897_s5 + $0x20] sm:$0xff]  ;;  %v363_v61 = vld [vmem:[%s897_s5 + $0x30] sm:$0xff]  ;;  %v364_v62 = vld [vmem:[%s897_s5 + $0x38] sm:$0xff] }
  0x2e   :  { %564 = vmatpush1.bf16.msra.mxu0 %v563_v45  ;;  %v375_v45 = vld [vmem:[%s897_s5 + $0x90] sm:$0xff]  ;;  %606 = vmatprep.subr.bf16.mxu1 %v605_v43  ;;  %v615_v59 = vpack.c.bf16 %v362_v56, %v361_v55  ;;  %v619_v1 = vpack.c.bf16 %v364_v62, %v363_v61  ;;  %v365_v3 = vld [vmem:[%s897_s5 + $0x40] sm:$0xff]  ;;  %v366_v4 = vld [vmem:[%s897_s5 + $0x48] sm:$0xff]  ;;  %v280_v38 = vsub.s32 1, %v275_v35 }
  0x2f   :  { %566 = vmatprep.subr.bf16.mxu0 %v565_v46  ;;  %v376_v46 = vld [vmem:[%s897_s5 + $0x98] sm:$0xff]  ;;  %608 = vmatpush3.bf16.msra.mxu1 %v607_v47  ;;  %v623_v7 = vpack.c.bf16 %v366_v4, %v365_v3  ;;  %v367_v9 = vld [vmem:[%s897_s5 + $0x50] sm:$0xff]  ;;  %v369_v25 = vld [vmem:[%s897_s5 + $0x60] sm:$0xff] }
  0x30   :  { %v609_v48 = vpack.c.bf16 %v376_v46, %v375_v45  ;;  %v368_v10 = vld [vmem:[%s897_s5 + $0x58] sm:$0xff]  ;;  %v370_v26 = vld [vmem:[%s897_s5 + $0x68] sm:$0xff]  ;;  %v387_v28 = vld [vmem:[%s897_s5 + $0xf0] sm:$0xff] }
  0x31   :  { %v627_v13 = vpack.c.bf16 %v368_v10, %v367_v9  ;;  %v388_v29 = vld [vmem:[%s897_s5 + $0xf8] sm:$0xff]  ;;  %v371_v31 = vld [vmem:[%s897_s5 + $0x70] sm:$0xff]  ;;  %v480_v37 = vld [vmem:[%s898_s6 + $0x1] ss:$4 sm:$0x3] }
  0x32   :  { %568 = vmatpush1.bf16.msra.mxu0 %v567_v51  ;;  %v377_v51 = vld [vmem:[%s897_s5 + $0xa0] sm:$0xff]  ;;  %610 = vmatprep.subr.bf16.mxu1 %v609_v48  ;;  %v372_v32 = vld [vmem:[%s897_s5 + $0x78] sm:$0xff]  ;;  %v281_v40 = vrot.slane %v480_v37, %v280_v38 }
  0x33   :  { %570 = vmatprep.subr.bf16.mxu0 %v569_v52  ;;  %v378_v52 = vld [vmem:[%s897_s5 + $0xa8] sm:$0xff]  ;;  %612 = vmatpush3.bf16.msra.mxu1 %v611_v53  ;;  %v485_v48 = vld [vmem:[%s898_s6 + $0x2] ss:$0 sm:$0xff] }
  0x34   :  { %v613_v54 = vpack.c.bf16 %v378_v52, %v377_v51 }
  0x36   :  { %572 = vmatpush1.bf16.msra.mxu0 %v571_v57  ;;  %v379_v57 = vld [vmem:[%s897_s5 + $0xb0] sm:$0xff]  ;;  %614 = vmatprep.subr.bf16.mxu1 %v613_v54 }
  0x37   :  { %574 = vmatprep.subr.bf16.mxu0 %v573_v58  ;;  %v380_v58 = vld [vmem:[%s897_s5 + $0xb8] sm:$0xff]  ;;  %616 = vmatpush3.bf16.msra.mxu1 %v615_v59 }
  0x38   :  { %v617_v60 = vpack.c.bf16 %v380_v58, %v379_v57 }
  0x3a   :  { %576 = vmatpush1.bf16.msra.mxu0 %v575_v63  ;;  %v381_v63 = vld [vmem:[%s897_s5 + $0xc0] sm:$0xff]  ;;  %618 = vmatprep.subr.bf16.mxu1 %v617_v60 }
  0x3b   :  { %578 = vmatprep.subr.bf16.mxu0 %v577_v0  ;;  %v382_v0 = vld [vmem:[%s897_s5 + $0xc8] sm:$0xff]  ;;  %620 = vmatpush3.bf16.msra.mxu1 %v619_v1 }
  0x3c   :  { %v621_v2 = vpack.c.bf16 %v382_v0, %v381_v63 }
  0x3e   :  { %580 = vmatpush1.bf16.msra.mxu0 %v579_v5  ;;  %v383_v5 = vld [vmem:[%s897_s5 + $0xd0] sm:$0xff]  ;;  %622 = vmatprep.subr.bf16.mxu1 %v621_v2 }
  0x3f   :  { %582 = vmatprep.subr.bf16.mxu0 %v581_v6  ;;  %v384_v6 = vld [vmem:[%s897_s5 + $0xd8] sm:$0xff]  ;;  %624 = vmatpush3.bf16.msra.mxu1 %v623_v7 }
  0x40   :  { %v625_v8 = vpack.c.bf16 %v384_v6, %v383_v5 }
  0x42   :  { %584 = vmatpush1.bf16.msra.mxu0 %v583_v11  ;;  %v385_v11 = vld [vmem:[%s897_s5 + $0xe0] sm:$0xff]  ;;  %626 = vmatprep.subr.bf16.mxu1 %v625_v8 }
  0x43   :  { %586 = vmatprep.subr.bf16.mxu0 %v585_v12  ;;  %v386_v12 = vld [vmem:[%s897_s5 + $0xe8] sm:$0xff]  ;;  %628 = vmatpush3.bf16.msra.mxu1 %v627_v13 }
  0x44   :  { %v629_v14 = vpack.c.bf16 %v386_v12, %v385_v11 }
  0x46   :  { %588 = vmatpush1.bf16.msra.mxu0 %v587_v17  ;;  %630 = vmatprep.subr.bf16.mxu1 %v629_v14  ;;  %v481_v17 = vld [vmem:[%s898_s6] ss:$0 sm:$0xff] }
  0x47   :  { %590 = vmatprep.subr.bf16.mxu0 %v589_v18  ;;  %v483_v18 = vld [vmem:[%s898_s6 + $0x4] ss:$0 sm:$0xff] }
  0x4a   :  { %592 = vmatpush1.bf16.msra.mxu0 %v591_v23 }
  0x4b   :  { %594 = vmatprep.subr.bf16.mxu0 %v593_v24 }
  0x4e   :  { %596 = vmatpush1.bf16.msra.mxu0 %v595_v27  ;;  %v631_v27 = vpack.c.bf16 %v370_v26, %v369_v25 }
  0x4f   :  { %598 = vmatprep.subr.bf16.mxu0 %v597_v30  ;;  %v633_v30 = vpack.c.bf16 %v388_v29, %v387_v28 }
  0x50   :  { %632 = vmatpush3.bf16.msra.mxu1 %v631_v27 }
  0x51   :  { %634 = vmatprep.subr.bf16.mxu1 %v633_v30 }
  0x52   :  { %600 = vmatpush1.bf16.msra.mxu0 %v599_v33  ;;  %v635_v33 = vpack.c.bf16 %v372_v32, %v371_v31 }
  0x53   :  { %602 = vmatprep.subr.bf16.mxu0 %v601_v36  ;;  %v276_v36 = vsub.s32 0, %v275_v35 }
  0x54   :  { %636 = vmatpush3.bf16.msra.mxu1 %v635_v33 }
  0x56   :  { %604 = vmatpush1.bf16.msra.mxu0 %v603_v39  ;;  %v277_v39 = vrot.slane %v480_v37, %v276_v36 }
  0xe9   :  { %v122_v15 = vpop.f32.mrb[0].mxu1 }
  0xea   :  { %v530_v16 = vpop.f32.mrb[1].mxu1  ;;  %v123_v19 = vadd.f32 %v481_v17, %v122_v15 }
  0xec   :  { %v126_v24 = vmax.f32 %v123_v19, 0.0 }
  0xee   :  { %v204_v20 = vpop.f32.mrb[2].mxu1 }
  0xef   :  { %v537_v21 = vpop.f32.mrb[3].mxu1  ;;  %v205_v22 = vadd.f32 %v483_v18, %v204_v20 }
  0xf1   :  { %v208_v23 = vmax.f32 %v205_v22, 0.0 }
  0xf3   :  { %348 = vmatprep.mubr.f32.mxu0 %v208_v23 }
  0xf4   :  { %349 = vmatmul.mubr.f32.vlgmr.msra.gmra.mrb[0].mxu0 %v126_v24 }
 0x1c7   :  { %v350_v41 = vpop.f32.mrb[0].mxu0 }
 0x1c8   :  { %v351_v42 = vadd.f32 %v350_v41, %v277_v39  ;;  %v352_v43 = vpop.f32.mrb[1].mxu0 }
 0x1c9   :  { %v353_v44 = vadd.f32 %v352_v43, %v281_v40 }
 0x1ca   :  { %v355_v46 = vmax.f32 %v351_v42, 0.0 }
 0x1cb   :  { %v356_v45 = vmax.f32 %v353_v44, 0.0 }
 0x1cd   :  { %457 = vmatprep.mubr.f32.mxu1 %v356_v45 }
 0x1ce   :  { %458 = vmatmul.mubr.f32.vlgmr.msra.gmra.mrb[4].mxu1 %v355_v46 }
 0x2a1   :  { %v523_v47 = vpop.f32.mrb[4].mxu1 }
 0x2a2   :  { %v524_v49 = vpop.f32.mrb[5].mxu1 }
 0x2a3   :  { %v525_v50 = vadd.f32 %v524_v49, %v523_v47 }
 0x2a5   :  { %v460_v51 = vadd.f32 %v525_v50, %v485_v48 }
 0x2a7   :  { %644 = vtanh.f32 %v460_v51 }
 0x2b1   :  { %v645_v52 = vpop.eup %644 }
 0x2b2   :  { %464 = vst.msk [vmem:[#allocation5] sm:$0xff] %vm52_vm1, %v645_v52 }
 0x2b3   :  { %679 = shalt.err (!%p676_p12)
}
 0x2b4   :  { %s680_s6 = scalar_lea.hbm %s899_s7, 128 }
 0x2b5   :  { %p681_p13 = scmp.ne.s32.totalorder %s899_s7, %s680_s6  ;;  %p684_p0 = scmp.lt.u32.totalorder %s680_s6, %s899_s7 }
 0x2b7   :  { %p686_p1 = pnand %p684_p0, %p681_p13 }
 0x2b9   :  { %689 = shalt.err (!%p686_p1)
}
 0x2ba   :  { %474 = dma.vmem_to_hbm [thread:$0]  %s472_s13, 128, %s899_s7, [#allocation4]  }
 0x2bb   :  { %692 = dma.done.wait [#allocation4], 128  }
 0x2bc   :  { %693 = vsyncadd [#allocation4], 4294967168 }
 0x2bd   :  { %478 = vsyncpa [#allocation3], 1 }
 0x2be   :  { %479 = vsyncpa [#allocation4], 1 }

</bundles_post_ra>
